<compile_context>
chip_gen: v6e
topology: v6e:2x2x1
jax: 0.10.0
libtpu: 0.0.40
codegen_flags: <defaults>
</compile_context>

<pallas_src>
import jax
import jax.numpy as jnp
from jax.experimental import pallas as pl
from jax.experimental.pallas import tpu as pltpu


def _img_attention_kernel(img_ref, wq_ref, ctx_ref):
    """img_ref: (BB, R, F) native dtype; wq_ref: (BB, F) f32; ctx_ref: (BB, F) f32."""
    bb, _, f = img_ref.shape
    cdt = img_ref.dtype

    # Attention logits over regions.  The Linear bias contributes a constant
    # (over r) term <bias, que[b]> that cancels in the softmax, so it is
    # omitted.  img_ref is read directly in each contraction so Mosaic keeps
    # the slab VMEM-backed instead of holding one huge live value across both
    # einsums.  (If v5e profiling ever shows the BB tiny matvecs poking above
    # the DMA, this first einsum can move to the VPU as a multiply+reduce.)
    wq = wq_ref[...].astype(cdt).reshape(bb, 1, f)                   # [BB,1,F]
    scores = jnp.einsum("bqf,brf->bqr", wq, img_ref[...],
                        preferred_element_type=jnp.float32)          # [BB,1,R]

    # Softmax over the region axis (last / lane axis).
    m = jnp.max(scores, axis=-1, keepdims=True)                      # [BB,1,1]
    e = jnp.exp(scores - m)                                          # [BB,1,R]
    denom = jnp.sum(e, axis=-1, keepdims=True)                       # [BB,1,1]
    # EUP approximate reciprocal + one Newton step: f32-accurate normalizer
    # without burning the VPU on a divide sequence.
    r0 = pl.reciprocal(denom, approx=True)
    recip = r0 * (2.0 - denom * r0)
    attn = (e * recip).astype(cdt)                                   # [BB,1,R]

    # Attention-weighted sum of the *raw* image features; the linear
    # projection is applied afterwards in the wrapper (exact because the
    # softmax weights sum to one).
    ctx = jnp.einsum("bqr,brf->bqf", attn, img_ref[...],
                     preferred_element_type=jnp.float32)             # [BB,1,F]
    ctx_ref[...] = ctx.reshape(bb, f).astype(ctx_ref.dtype)          # dense store

    # TODO(synk): the optional `mask` argument of the PyTorch module
    # (masked_fill with -inf on the logits before softmax) is not wired in;
    # this implements the default mask=None path.


def _round_up(x, m):
    return ((x + m - 1) // m) * m


def _per_batch_vmem_bytes(R, F, img_itemsize):
    """Double-buffered VMEM bytes per batch row: img slab + f32 wq/ctx blocks."""
    sub = 8 if img_itemsize >= 4 else 16           # sublane tile for img dtype
    r_pad = _round_up(R, sub)
    f_pad = _round_up(F, 128)
    return 2 * r_pad * f_pad * img_itemsize + 2 * 2 * 4 * f_pad


def _vmem_plan():
    """(block-sizing budget, cap for vmem_limit_bytes) per TPU generation."""
    try:
        kind = jax.devices()[0].device_kind.lower()
    except Exception:
        kind = ""
    if ("v5" in kind) or ("v6" in kind):
        # 128 MiB physical VMEM; the small scoped default is raised explicitly.
        return 72 * 1024 * 1024, 100 * 1024 * 1024
    # v7x (64 MiB VMEM per TensorCore) or unknown generation: stay conservative.
    return 32 * 1024 * 1024, 48 * 1024 * 1024


def _choose_batch_block(B, R, F, img_itemsize, buf_budget):
    """Batch rows per grid step: big enough to amortize per-step overhead,
    small enough that all double-buffered blocks fit the VMEM budget."""
    per_batch = _per_batch_vmem_bytes(R, F, img_itemsize)
    bb = max(1, buf_budget // per_batch)
    if bb >= B:
        if B <= 8:
            return int(B)                 # block spans the full (tiny) batch dim
        # Whole batch fits in VMEM: still split into >= 2 grid steps so both
        # v7x TensorCores issue DMAs on the "parallel" batch axis.
        return int(max(8, (((B + 1) // 2) // 8) * 8))
    if bb >= 8:
        return int((bb // 8) * 8)         # multiple of 8 -> dense sublane tiling
    # Very large R*F per batch row: keep the 2-D wq/ctx blocks sublane aligned;
    # the caller raises vmem_limit_bytes from the real footprint.
    return 8


def image_feature_model(que, img_fea, weight, bias, *, batch_block=None):
    """que: [B, D] f32, img_fea: [B, R, F] (streamed in native dtype),
    weight: [D, F] (PyTorch Linear layout), bias: [D]."""
    B, R, F = img_fea.shape

    que = que.astype(jnp.float32)
    weight = weight.astype(jnp.float32)
    bias = bias.astype(jnp.float32)
    # img_fea is deliberately NOT up-cast: it is streamed in its native dtype.

    # Pre-contract the question with the projection weight: wq[b] = W^T que[b].
    wq = jnp.dot(que, weight, preferred_element_type=jnp.float32)        # [B, F]

    itemsize = jnp.dtype(img_fea.dtype).itemsize
    budget, vmem_cap = _vmem_plan()
    BB = int(batch_block) if batch_block is not None else _choose_batch_block(
        B, R, F, itemsize, budget)
    BB = max(1, min(BB, B))

    footprint = BB * _per_batch_vmem_bytes(R, F, itemsize)
    vmem_limit = None
    if footprint + (4 << 20) > (12 << 20):     # only override when actually needed
        vmem_limit = int(min(max(footprint + (8 << 20), 32 << 20), vmem_cap))

    cost = pl.CostEstimate(
        flops=4 * B * R * F,                                   # two contractions
        transcendentals=B * R,                                 # softmax exp
        bytes_accessed=B * R * F * itemsize + 8 * B * F,       # img + wq + ctx
    )

    ctx = pl.pallas_call(
        _img_attention_kernel,
        out_shape=jax.ShapeDtypeStruct((B, F), jnp.float32),
        grid_spec=pltpu.PrefetchScalarGridSpec(
            num_scalar_prefetch=0,
            grid=(pl.cdiv(B, BB),),                 # ragged tail handled by Pallas
            in_specs=[
                pl.BlockSpec((BB, R, F), lambda b: (b, 0, 0)),   # img slab
                pl.BlockSpec((BB, F), lambda b: (b, 0)),         # wq (dense 2-D)
            ],
            out_specs=pl.BlockSpec((BB, F), lambda b: (b, 0)),   # ctx (dense 2-D)
        ),
        compiler_params=pltpu.CompilerParams(
            dimension_semantics=("parallel",),
            vmem_limit_bytes=vmem_limit),
        cost_estimate=cost,
    )(img_fea, wq)

    # Tiny finishing projection (one [B,F] x [F,D] matmul + bias, left to XLA);
    # exact because the softmax weights sum to one.
    return jnp.dot(ctx, weight.T, preferred_element_type=jnp.float32) + bias


def _reference(que, img_fea, weight, bias):
    proj = jnp.einsum("brf,df->brd", img_fea, weight) + bias            # [B, R, D]
    scores = jnp.einsum("brd,bd->br", proj, que)                        # [B, R]
    attn = jax.nn.softmax(scores, axis=-1)                              # [B, R]
    return jnp.einsum("br,brd->bd", attn, proj)                         # [B, D]


if __name__ == "__main__":
    key = jax.random.PRNGKey(0)

    def make_case(k, B, R, F, D, img_dtype=jnp.float32):
        k1, k2, k3, k4 = jax.random.split(k, 4)
        que = jax.random.normal(k1, (B, D), dtype=jnp.float32)
        img = jax.random.normal(k2, (B, R, F), dtype=jnp.float32).astype(img_dtype)
        bound = 1.0 / (F ** 0.5)
        w = jax.random.uniform(k3, (D, F), minval=-bound, maxval=bound,
                               dtype=jnp.float32)
        b = jax.random.uniform(k4, (D,), minval=-bound, maxval=bound,
                               dtype=jnp.float32)
        return que, img, w, b

    # Case 1: module-sized small shapes; whole batch in a single grid step.
    key, sub = jax.random.split(key)
    que, img, w, b = make_case(sub, B=2, R=16, F=64, D=32)
    out = jax.block_until_ready(image_feature_model(que, img, w, b))
    ref = _reference(que, img.astype(jnp.float32), w, b)
    assert out.shape == (2, 32)
    assert jnp.allclose(out, ref, atol=2e-4, rtol=2e-4), "case 1 mismatch vs reference"

    # Case 2: explicit batch blocking with a ragged tail (B=10, BB=8 -> grid=2,
    # no wrapper-side padding of img).
    key, sub = jax.random.split(key)
    que, img, w, b = make_case(sub, B=10, R=16, F=128, D=32)
    out = jax.block_until_ready(
        image_feature_model(que, img, w, b, batch_block=8))
    ref = _reference(que, img.astype(jnp.float32), w, b)
    assert out.shape == (10, 32)
    assert jnp.allclose(out, ref, atol=2e-4, rtol=2e-4), "case 2 mismatch vs reference"

    # Case 3: bf16 image features streamed natively (heuristic BB, ragged tail).
    key, sub = jax.random.split(key)
    que, img, w, b = make_case(sub, B=12, R=16, F=128, D=32, img_dtype=jnp.bfloat16)
    out = jax.block_until_ready(image_feature_model(que, img, w, b))
    ref = _reference(que, img.astype(jnp.float32), w, b)
    assert out.shape == (12, 32)
    assert jnp.allclose(out, ref, atol=5e-2, rtol=5e-2), "case 3 mismatch vs reference"

    print("KERNEL_OK")
</pallas_src>

<mosaic_0001>
module attributes {stable_mosaic.version = 11 : i64} {
  func.func @_img_attention_kernel(%arg0: i32, %arg1: memref<2x16x64xf32, #tpu.memory_space<vmem>>, %arg2: memref<2x64xf32, #tpu.memory_space<vmem>>, %arg3: memref<2x64xf32, #tpu.memory_space<vmem>>) attributes {dimension_semantics = [#tpu.dimension_semantics<parallel>], iteration_bounds = array<i64: 1>, scalar_prefetch = 0 : i64, scratch_operands = 0 : i64, tpu.core_type = #tpu.core_type<tc>, window_params = [{transform_indices = @transform_0, window_bounds = array<i64: 2, 16, 64>}, {transform_indices = @transform_1, window_bounds = array<i64: 2, 64>}, {transform_indices = @transform_2, window_bounds = array<i64: 2, 64>}]} {
    %c0 = arith.constant 0 : index
    %c0_0 = arith.constant 0 : index
    %0 = vector.load %arg2[%c0, %c0_0] : memref<2x64xf32, #tpu.memory_space<vmem>>, vector<2x64xf32>
    %1 = vector.shape_cast %0 : vector<2x64xf32> to vector<2x1x64xf32>
    %c0_1 = arith.constant 0 : index
    %c0_2 = arith.constant 0 : index
    %c0_3 = arith.constant 0 : index
    %2 = vector.load %arg1[%c0_1, %c0_2, %c0_3] : memref<2x16x64xf32, #tpu.memory_space<vmem>>, vector<2x16x64xf32>
    "tpu.trace_start"() <{level = 10 : i32, message = "bqf,brf->bqr"}> : () -> ()
    %cst = arith.constant dense<0.000000e+00> : vector<2x1x16xf32>
    %3 = tpu.matmul %1, %2, %cst {dimension_numbers = #tpu.dot_dimension_numbers<[2], [2], [1], [1], [0, 0, 0, 1, 1, 1], [0], [0]>} : vector<2x1x64xf32>, vector<2x16x64xf32>, vector<2x1x16xf32> -> vector<2x1x16xf32>
    "tpu.trace_stop"() : () -> ()
    %cst_4 = arith.constant dense<0xFF800000> : vector<2x1xf32>
    %4 = vector.multi_reduction <maximumf>, %3, %cst_4 [2] : vector<2x1x16xf32> to vector<2x1xf32>
    %5 = vector.shape_cast %4 : vector<2x1xf32> to vector<2x1x1xf32>
    %6 = vector.broadcast %5 : vector<2x1x1xf32> to vector<2x1x16xf32>
    %7 = arith.subf %3, %6 : vector<2x1x16xf32>
    %8 = math.exp %7 : vector<2x1x16xf32>
    %cst_5 = arith.constant dense<0.000000e+00> : vector<2x1xf32>
    %9 = vector.multi_reduction <add>, %8, %cst_5 [2] : vector<2x1x16xf32> to vector<2x1xf32>
    %10 = vector.shape_cast %9 : vector<2x1xf32> to vector<2x1x1xf32>
    %11 = tpu.reciprocal %10 {approx = true} : vector<2x1x1xf32> -> vector<2x1x1xf32>
    %12 = arith.mulf %10, %11 : vector<2x1x1xf32>
    %cst_6 = arith.constant 2.000000e+00 : f32
    %13 = vector.broadcast %cst_6 : f32 to vector<2x1x1xf32>
    %14 = arith.subf %13, %12 : vector<2x1x1xf32>
    %15 = arith.mulf %11, %14 : vector<2x1x1xf32>
    %16 = vector.broadcast %15 : vector<2x1x1xf32> to vector<2x1x16xf32>
    %17 = arith.mulf %8, %16 : vector<2x1x16xf32>
    %c0_7 = arith.constant 0 : index
    %c0_8 = arith.constant 0 : index
    %c0_9 = arith.constant 0 : index
    %18 = vector.load %arg1[%c0_7, %c0_8, %c0_9] : memref<2x16x64xf32, #tpu.memory_space<vmem>>, vector<2x16x64xf32>
    "tpu.trace_start"() <{level = 10 : i32, message = "bqr,brf->bqf"}> : () -> ()
    %cst_10 = arith.constant dense<0.000000e+00> : vector<2x1x64xf32>
    %19 = tpu.matmul %17, %18, %cst_10 {dimension_numbers = #tpu.dot_dimension_numbers<[2], [1], [1], [2], [0, 0, 0, 1, 1, 2], [0], [0]>} : vector<2x1x16xf32>, vector<2x16x64xf32>, vector<2x1x64xf32> -> vector<2x1x64xf32>
    "tpu.trace_stop"() : () -> ()
    %20 = vector.shape_cast %19 : vector<2x1x64xf32> to vector<2x64xf32>
    %c0_11 = arith.constant 0 : index
    %c0_12 = arith.constant 0 : index
    %21 = vector.load %arg3[%c0_11, %c0_12] : memref<2x64xf32, #tpu.memory_space<vmem>>, vector<2x64xf32>
    tpu.vector_store %arg3[%c0_11, %c0_12], %20 {strides = array<i32>} : memref<2x64xf32, #tpu.memory_space<vmem>>, vector<2x64xf32>,
    return
  }
  func.func @transform_0(%arg0: i32) -> (i32, i32, i32) {
    %c0_i32 = arith.constant 0 : i32
    %c0_i32_0 = arith.constant 0 : i32
    %c0_i32_1 = arith.constant 0 : i32
    return %arg0, %c0_i32, %c0_i32_0 : i32, i32, i32
  }
  func.func @transform_1(%arg0: i32) -> (i32, i32) {
    %c0_i32 = arith.constant 0 : i32
    %c0_i32_0 = arith.constant 0 : i32
    return %arg0, %c0_i32 : i32, i32
  }
  func.func @transform_2(%arg0: i32) -> (i32, i32) {
    %c0_i32 = arith.constant 0 : i32
    %c0_i32_0 = arith.constant 0 : i32
    return %arg0, %c0_i32 : i32, i32
  }
}

</mosaic_0001>

<bundles_post_ra>
// kernel: tpu_custom_call.1
= control target key start
LH: loop header
LB: loop body
LE: loop exit
PB: predicated region body
PF: predicated region fallthrough
CT: control target
= control target key end

     0   :  { %7 = vsyncpa [#allocation3], 0  ;;  %s604_s0 = inlined_call_operand.hbm [shape: f32[2,16,64], index: 0, kind: input, shape index: {}]   ;;  %s605_s1 = inlined_call_operand.hbm [shape: f32[2,64], index: 1, kind: input, shape index: {}]   ;;  %s606_s2 = inlined_call_operand.hbm [shape: f32[2,64], index: 2, kind: output, shape index: {}]  }
   0x1   :  { %8 = vsyncpa [#allocation6], 0 }
   0x2   :  { %9 = vsyncpa [#allocation4], 0  ;;  %s558_s9 = smov [#allocation2]  }
   0x3   :  { %s15_s10 = sshll.u32 %s558_s9, 4  ;;  %s16_s10 = int_to_ptr.vmem [resolvable:$true] %s15_s10 }
   0x4   :  { %s500_s11 = scalar_lea.vmem %s16_s10, 512  ;;  %p505_p1 = scmp.lt.s32.totalorder %s16_s10, %s16_s10 }
   0x5   :  { %p501_p0 = scmp.ne.s32.totalorder %s16_s10, %s500_s11  ;;  %p506_p2 = scmp.lt.s32.totalorder %s500_s11, %s500_s11 }
   0x7   :  { %p507_p3 = por %p506_p2, %p505_p1 }
   0x9   :  { %p508_p4 = pnand %p507_p3, %p501_p0 }
   0xb   :  { %511 = shalt.err (!%p508_p4)
}
   0xc   :  { %s559_s12 = smov 128   ;;  %s560_s13 = smov 8  }
   0xd   :  { %21 = dma.hbm_to_vmem [thread:$0]  %s604_s0, 512, %s16_s10, [#allocation3], %s559_s12, %s559_s12, %s560_s13  }
   0xe   :  { %s561_s16 = smov [#allocation5]  }
   0xf   :  { %s28_s17 = sshll.u32 %s561_s16, 4  ;;  %s29_s17 = int_to_ptr.vmem [resolvable:$true] %s28_s17 }
  0x10   :  { %s520_s18 = scalar_lea.vmem %s29_s17, 32  ;;  %p525_p6 = scmp.lt.s32.totalorder %s29_s17, %s29_s17 }
  0x11   :  { %p521_p5 = scmp.ne.s32.totalorder %s29_s17, %s520_s18  ;;  %p526_p7 = scmp.lt.s32.totalorder %s520_s18, %s520_s18 }
  0x13   :  { %p527_p8 = por %p526_p7, %p525_p6 }
  0x15   :  { %p528_p9 = pnand %p527_p8, %p521_p5 }
  0x17   :  { %531 = shalt.err (!%p528_p9)
}
  0x18   :  { %31 = dma.hbm_to_vmem [thread:$0]  %s605_s1, 32, %s29_s17, [#allocation6]  }
  0x19   :  { %552 = dma.done.wait [#allocation3], 512  }
  0x1a   :  { %553 = vsyncadd [#allocation3], 4294966784 }
  0x1b   :  { %554 = dma.done.wait [#allocation6], 32  }
  0x1c   :  { %555 = vsyncadd [#allocation6], 4294967264  ;;  %v51_v0 = vlaneseq  ;;  %v562_v1 = vmov 0.0   ;;  %vm563_vm0 = vmmov 0   ;;  %v564_v2 = vmov 1966171168  }
  0x1d   :  { %455 = vmatprep.subr.mxu1 %v562_v1  ;;  %448 = vmatprep.subr.mxu0 %v562_v1  ;;  %v49_v3 = vunpack.c.l.s4 %v564_v2  ;;  %vm66_vm1 = vcmask 523264   ;;  %v65_v6 = vld [vmem:[#allocation2 + $0x18] sm:$0xff]  ;;  %v63_v7 = vld [vmem:[#allocation2 + $0x8] sm:$0xff]  ;;  %v64_v10 = vld [vmem:[#allocation2 + $0x10] sm:$0xff]  ;;  %vm223_vm2 = vcmask 122880   ;;  %vm256_vm3 = vcmask 130048  }
  0x1e   :  { %459 = vmatprep.mubr.msk.f32.mxu1 %vm563_vm0, %v562_v1  ;;  %452 = vmatprep.mubr.msk.f32.mxu0 %vm563_vm0, %v562_v1  ;;  %v52_v4 = vshrl.u32 %v51_v0, 7  ;;  %v427_v9 = vld.sshfl [vmem:[#allocation5] sm:$0x11 pattern:$0x75316420]  ;;  %s565_s0 = smov [#allocation7]  }
  0x1f   :  { %v50_v5 = vunpack.c.0.s8 %v49_v3  ;;  %456 = vmatpush3.xpose.msk.msra.mxu1 %vm66_vm1, %v65_v6  ;;  %449 = vmatpush3.xpose.msk.msra.mxu0 %vm66_vm1, %v63_v7  ;;  %v62_v11 = vld [vmem:[#allocation2] sm:$0xff]  ;;  %v47_v12 = vcombine.high %v427_v9, %v427_v9  ;;  %s417_s1 = sshll.u32 %s565_s0, 4  ;;  %vm406_vm4 = vcmask 1041409   ;;  %vm409_vm5 = vcmask 517120   ;;  %s418_s1 = int_to_ptr.vmem [resolvable:$true] %s417_s1 }
  0x20   :  { %457 = vmatprep.subr.mxu1 %v562_v1  ;;  %450 = vmatprep.subr.mxu0 %v562_v1  ;;  %s532_s21 = scalar_lea.vmem %s418_s1, 32  ;;  %p537_p11 = scmp.lt.s32.totalorder %s418_s1, %s418_s1 }
  0x21   :  { %v53_v8 = vsub.s32 %v50_v5, %v52_v4  ;;  %p533_p10 = scmp.ne.s32.totalorder %s418_s1, %s532_s21  ;;  %p538_p12 = scmp.lt.s32.totalorder %s532_s21, %s532_s21 }
  0x23   :  { %v61_v13 = vrot.slane %v47_v12, %v53_v8  ;;  %v54_v14 = vrot.slane %v427_v9, %v53_v8  ;;  %458 = vmatpush3.xpose.msk.msra.mxu1 %vm66_vm1, %v64_v10  ;;  %451 = vmatpush3.xpose.msk.msra.mxu0 %vm66_vm1, %v62_v11  ;;  %p539_p13 = por %p538_p12, %p537_p11 }
  0x24   :  { %469 = vmatprep.subr.mxu1 %v562_v1  ;;  %462 = vmatprep.subr.mxu0 %v562_v1 }
  0x25   :  { %p540_p0 = pnand %p539_p13, %p533_p10 }
  0x26   :  { %460 = vmatmul.mubr.msk.f32.vlgmr.msra.gmra.mxu1 %vm66_vm1, %v61_v13  ;;  %453 = vmatmul.mubr.msk.f32.vlgmr.msra.gmra.mxu0 %vm66_vm1, %v54_v14 }
  0x27   :  { %470 = vmatpush3.msra.mxu1 %v65_v6  ;;  %473 = vmatprep.mubr.msk.f32.mxu1 %vm563_vm0, %v562_v1 }
  0x28   :  { %471 = vmatprep.subr.mxu1 %v562_v1  ;;  %463 = vmatpush3.msra.mxu0 %v63_v7 }
  0x29   :  { %472 = vmatpush3.msra.mxu1 %v64_v10  ;;  %464 = vmatprep.subr.mxu0 %v562_v1 }
  0x2a   :  { %465 = vmatpush3.msra.mxu0 %v62_v11  ;;  %466 = vmatprep.mubr.msk.f32.mxu0 %vm563_vm0, %v562_v1 }
  0xe6   :  { %v219_v15 = vpop.f32.mrf.mxu1  ;;  %v141_v16 = vpop.f32.mrf.mxu0 }
  0xe7   :  { %v227_v17 = vsel %vm223_vm2, %v219_v15, -inf  ;;  %v224_v20 = vsel %vm223_vm2, %v141_v16, -inf }
  0xe8   :  { %228 = vmax.xlane.f32.xlu0 %v227_v17  ;;  %v461_v18 = vpop.f32.mrf.mxu1  ;;  %v454_v19 = vpop.f32.mrf.mxu0 }
  0xec   :  { %225 = vmax.xlane.f32.xlu0 %v224_v20 }
 0x171   :  { %v229_v21 = vpop.xlane.xlu0 %228 }
 0x172   :  { %v231_v22 = vsub.f32 %v219_v15, %v229_v21 }
 0x174   :  { %v234_v23 = vmul.f32 1.442695, %v231_v22 }
 0x175   :  { %v226_v24 = vpop.xlane.xlu0 %225 }
 0x176   :  { %484 = vpow2.f32 %v234_v23  ;;  %v230_v25 = vsub.f32 %v141_v16, %v226_v24 }
 0x178   :  { %v232_v26 = vmul.f32 1.442695, %v230_v25 }
 0x17a   :  { %486 = vpow2.f32 %v232_v26 }
 0x183   :  { %v485_v27 = vpop.eup %484 }
 0x184   :  { %v239_v28 = vsel %vm223_vm2, %v485_v27, 0.0 }
 0x185   :  { %240 = vadd.xlane.f32.xlu1 %v239_v28 }
 0x187   :  { %v487_v29 = vpop.eup %486 }
 0x188   :  { %v236_v30 = vsel %vm223_vm2, %v487_v29, 0.0 }
 0x189   :  { %237 = vadd.xlane.f32.xlu1 %v236_v30 }
 0x20e   :  { %v241_v31 = vpop.xlane.xlu1 %240 }
 0x20f   :  { %488 = vrcp.f32 %v241_v31 }
 0x212   :  { %v238_v32 = vpop.xlane.xlu1 %237 }
 0x213   :  { %490 = vrcp.f32 %v238_v32 }
 0x21c   :  { %v489_v33 = vpop.eup %488 }
 0x21d   :  { %v245_v34 = vmul.f32 %v489_v33, %v241_v31 }
 0x21f   :  { %v247_v35 = vsub.f32 2.0, %v245_v34 }
 0x220   :  { %v491_v36 = vpop.eup %490 }
 0x221   :  { %v249_v37 = vmul.f32 %v489_v33, %v247_v35  ;;  %v244_v38 = vmul.f32 %v491_v36, %v238_v32 }
 0x223   :  { %v251_v39 = vmul.f32 %v485_v27, %v249_v37  ;;  %v246_v40 = vsub.f32 2.0, %v244_v38 }
 0x225   :  { %v248_v41 = vmul.f32 %v491_v36, %v246_v40  ;;  %474 = vmatmul.mubr.msk.f32.vlgmr.msra.gmra.mxu1 %vm256_vm3, %v251_v39 }
 0x227   :  { %v250_v42 = vmul.f32 %v487_v29, %v248_v41 }
 0x229   :  { %467 = vmatmul.mubr.msk.f32.vlgmr.msra.gmra.mxu0 %vm256_vm3, %v250_v42 }
 0x2e5   :  { %v399_v43 = vpop.f32.mrf.mxu1 }
 0x2e6   :  { %v405_v45 = vrot.slane %v399_v43, 7 }
 0x2e7   :  { %v475_v44 = vpop.f32.mrf.mxu1 }
 0x2e9   :  { %v326_v46 = vpop.f32.mrf.mxu0 }
 0x2ea   :  { %v407_v47 = vsel %vm406_vm4, %v405_v45, %v326_v46 }
 0x2eb   :  { %v468_v48 = vpop.f32.mrf.mxu0  ;;  %410 = vst.msk [vmem:[#allocation7] sm:$0x3] %vm409_vm5, %v407_v47 }
 0x2ec   :  { %543 = shalt.err (!%p540_p0)
}
 0x2ed   :  { %420 = dma.vmem_to_hbm [thread:$0]  %s418_s1, 32, %s606_s2, [#allocation4]  }
 0x2ee   :  { %556 = dma.done.wait [#allocation4], 32  }
 0x2ef   :  { %557 = vsyncadd [#allocation4], 4294967264 }
 0x2f0   :  { %424 = vsyncpa [#allocation3], 1 }
 0x2f1   :  { %425 = vsyncpa [#allocation6], 1 }
 0x2f2   :  { %426 = vsyncpa [#allocation4], 1 }

</bundles_post_ra>
